<compile_context>
chip_gen: v5e
topology: v5e:2x2
jax: 0.10.0
libtpu: 0.0.40
codegen_flags: <defaults>
</compile_context>

<pallas_src>
import jax
import jax.numpy as jnp
from jax.experimental import pallas as pl
from jax.experimental.pallas import tpu as pltpu

_EPS = 1e-6  # matches torch.nn.functional.pairwise_distance default eps


def _contrastive_loss_kernel(o1_ref, o2_ref, label_ref, out_ref, *,
                             margin, n_valid, tile_rows):
    i = pl.program_id(0)

    # Init the resident (1, 1) output accumulator on the first tile.
    @pl.when(i == 0)
    def _():
        out_ref[...] = jnp.zeros_like(out_ref)

    o1 = o1_ref[...].astype(jnp.float32)          # (TB, D)
    o2 = o2_ref[...].astype(jnp.float32)          # (TB, D)
    label = label_ref[...].astype(jnp.float32)    # (TB, 1)

    diff = o1 - o2 + _EPS                         # torch adds eps to the difference
    dist_sq = jnp.sum(diff * diff, axis=-1, keepdims=True)   # (TB, 1)
    dist = jnp.sqrt(dist_sq)                                  # (TB, 1)

    hinge = jnp.maximum(margin - dist, 0.0)
    per_sample = (1.0 - label) * dist_sq + label * hinge * hinge   # (TB, 1)

    # Mask out rows that are padding (global row index >= true batch size).
    rows = jax.lax.broadcasted_iota(jnp.int32, per_sample.shape, 0) + i * tile_rows
    per_sample = jnp.where(rows < n_valid, per_sample, 0.0)

    # Raw partial sum per tile; the divide-by-B happens once at finalize.
    out_ref[...] += jnp.sum(per_sample, keepdims=True)

    @pl.when(i == pl.num_programs(0) - 1)
    def _():
        out_ref[...] = out_ref[...] * (1.0 / float(n_valid))


def _pick_tile_rows(batch, feat, itemsize):
    # 2 embedding inputs x 2 pipeline buffers x TB x D x itemsize should stay
    # comfortably under the scoped VMEM limit on every generation (v7x has
    # only 64 MiB physical / 32 MiB default scoped), so budget ~8 MiB total.
    budget = 8 * 1024 * 1024
    sub = max(8, 32 // itemsize)          # 8 for f32, 16 for bf16, 32 for int8
    tb = budget // max(1, 4 * feat * itemsize)
    tb = max(sub, min(1024, tb))
    tb = (tb // sub) * sub
    # No point tiling beyond the (sublane-padded) batch itself.
    b_pad = ((batch + sub - 1) // sub) * sub
    tb = min(tb, b_pad)
    return max(sub, (tb // sub) * sub)


def contrastive_loss(output1, output2, label, margin: float = 1.0):
    """output1, output2: (B, D); label: (B, 1) or (B,). Returns scalar loss."""
    B, D = output1.shape
    assert output2.shape == (B, D)
    label = jnp.reshape(label, (B, 1))

    itemsize = jnp.dtype(output1.dtype).itemsize
    tb = _pick_tile_rows(B, D, itemsize)
    num_tiles = pl.cdiv(B, tb)
    b_pad = num_tiles * tb
    if b_pad != B:
        pad = b_pad - B
        output1 = jnp.pad(output1, ((0, pad), (0, 0)))
        output2 = jnp.pad(output2, ((0, pad), (0, 0)))
        label = jnp.pad(label, ((0, pad), (0, 0)))

    kernel = lambda a, b, l, o: _contrastive_loss_kernel(
        a, b, l, o, margin=margin, n_valid=B, tile_rows=tb)

    cost = pl.CostEstimate(
        flops=4 * B * D,
        transcendentals=B,
        bytes_accessed=(2 * B * D + B) * itemsize + 4,
    )

    out = pl.pallas_call(
        kernel,
        out_shape=jax.ShapeDtypeStruct((1, 1), jnp.float32),
        grid=(num_tiles,),
        in_specs=[
            pl.BlockSpec((tb, D), lambda i: (i, 0)),
            pl.BlockSpec((tb, D), lambda i: (i, 0)),
            pl.BlockSpec((tb, 1), lambda i: (i, 0)),
        ],
        out_specs=pl.BlockSpec((1, 1), lambda i: (0, 0)),
        compiler_params=pltpu.CompilerParams(
            dimension_semantics=("arbitrary",),
            vmem_limit_bytes=32 * 1024 * 1024,
        ),
        cost_estimate=cost,
    )(output1, output2, label)
    return out[0, 0]


def _reference(output1, output2, label, margin=1.0):
    # Pure-JAX reference mirroring the PyTorch forward.
    diff = output1.astype(jnp.float32) - output2.astype(jnp.float32) + _EPS
    dist = jnp.sqrt(jnp.sum(diff * diff, axis=-1, keepdims=True))
    hinge = jnp.maximum(margin - dist, 0.0)
    label = jnp.reshape(label, (-1, 1)).astype(jnp.float32)
    return jnp.mean((1.0 - label) * dist**2 + label * hinge**2)


if __name__ == "__main__":
    B, D = 8, 32
    key = jax.random.PRNGKey(0)
    k1, k2, k3 = jax.random.split(key, 3)

    output1 = jax.random.normal(k1, (B, D), dtype=jnp.float32)
    output2 = jax.random.normal(k2, (B, D), dtype=jnp.float32)
    label = jax.random.bernoulli(k3, p=0.5, shape=(B, 1)).astype(jnp.float32)

    loss = contrastive_loss(output1, output2, label, margin=1.0)
    loss = jax.block_until_ready(loss)

    ref = _reference(output1, output2, label, margin=1.0)
    assert jnp.allclose(loss, ref, rtol=1e-5, atol=1e-5), (loss, ref)

    # Also exercise a non-multiple-of-tile batch to validate the masking path.
    B2 = 13
    o1b = jax.random.normal(k1, (B2, D), dtype=jnp.float32)
    o2b = jax.random.normal(k2, (B2, D), dtype=jnp.float32)
    lb = jax.random.bernoulli(k3, p=0.5, shape=(B2, 1)).astype(jnp.float32)
    loss2 = jax.block_until_ready(contrastive_loss(o1b, o2b, lb, margin=1.0))
    ref2 = _reference(o1b, o2b, lb, margin=1.0)
    assert jnp.allclose(loss2, ref2, rtol=1e-5, atol=1e-5), (loss2, ref2)

    print("KERNEL_OK")
</pallas_src>

<mosaic_0001>
module attributes {stable_mosaic.version = 11 : i64} {
  func.func @_lambda_(%arg0: i32, %arg1: memref<8x32xf32, #tpu.memory_space<vmem>>, %arg2: memref<8x32xf32, #tpu.memory_space<vmem>>, %arg3: memref<8x1xf32, #tpu.memory_space<vmem>>, %arg4: memref<1x1xf32, #tpu.memory_space<vmem>>) attributes {dimension_semantics = [#tpu.dimension_semantics<arbitrary>], iteration_bounds = array<i64: 1>, scalar_prefetch = 0 : i64, scratch_operands = 0 : i64, tpu.core_type = #tpu.core_type<tc>, window_params = [{transform_indices = @transform_0, window_bounds = array<i64: 8, 32>}, {transform_indices = @transform_1, window_bounds = array<i64: 8, 32>}, {transform_indices = @transform_2, window_bounds = array<i64: 8, 1>}, {pipeline_mode = #tpu.pipeline_mode<synchronous>, transform_indices = @transform_3, window_bounds = array<i64: 1, 1>}]} {
    %c0_i32 = arith.constant 0 : i32
    %0 = arith.cmpi eq, %arg0, %c0_i32 : i32
    %1 = arith.extui %0 : i1 to i32
    %c0_i32_0 = arith.constant 0 : i32
    %2 = arith.cmpi ne, %1, %c0_i32_0 : i32
    scf.if %2 {
      %cst_19 = arith.constant 0.000000e+00 : f32
      %42 = vector.broadcast %cst_19 : f32 to vector<1x1xf32>
      %c0_20 = arith.constant 0 : index
      %c0_21 = arith.constant 0 : index
      %43 = vector.load %arg4[%c0_20, %c0_21] : memref<1x1xf32, #tpu.memory_space<vmem>>, vector<1x1xf32>
      tpu.vector_store %arg4[%c0_20, %c0_21], %42 {strides = array<i32>} : memref<1x1xf32, #tpu.memory_space<vmem>>, vector<1x1xf32>,
    } else {
    }
    %c0 = arith.constant 0 : index
    %c0_1 = arith.constant 0 : index
    %3 = vector.load %arg1[%c0, %c0_1] : memref<8x32xf32, #tpu.memory_space<vmem>>, vector<8x32xf32>
    %c0_2 = arith.constant 0 : index
    %c0_3 = arith.constant 0 : index
    %4 = vector.load %arg2[%c0_2, %c0_3] : memref<8x32xf32, #tpu.memory_space<vmem>>, vector<8x32xf32>
    %c0_4 = arith.constant 0 : index
    %c0_5 = arith.constant 0 : index
    %5 = vector.load %arg3[%c0_4, %c0_5] : memref<8x1xf32, #tpu.memory_space<vmem>>, vector<8x1xf32>
    %6 = arith.subf %3, %4 : vector<8x32xf32>
    %cst = arith.constant 9.99999997E-7 : f32
    %7 = vector.broadcast %cst : f32 to vector<8x32xf32>
    %8 = arith.addf %6, %7 : vector<8x32xf32>
    %9 = arith.mulf %8, %8 : vector<8x32xf32>
    %cst_6 = arith.constant dense<0.000000e+00> : vector<8xf32>
    %10 = vector.multi_reduction <add>, %9, %cst_6 [1] : vector<8x32xf32> to vector<8xf32>
    %11 = vector.shape_cast %10 : vector<8xf32> to vector<8x1xf32>
    %12 = math.sqrt %11 : vector<8x1xf32>
    %cst_7 = arith.constant 1.000000e+00 : f32
    %13 = vector.broadcast %cst_7 : f32 to vector<8x1xf32>
    %14 = arith.subf %13, %12 : vector<8x1xf32>
    %cst_8 = arith.constant 0.000000e+00 : f32
    %15 = vector.broadcast %cst_8 : f32 to vector<8x1xf32>
    %16 = arith.maximumf %14, %15 : vector<8x1xf32>
    %cst_9 = arith.constant 1.000000e+00 : f32
    %17 = vector.broadcast %cst_9 : f32 to vector<8x1xf32>
    %18 = arith.subf %17, %5 : vector<8x1xf32>
    %19 = arith.mulf %18, %11 : vector<8x1xf32>
    %20 = arith.mulf %5, %16 : vector<8x1xf32>
    %21 = arith.mulf %20, %16 : vector<8x1xf32>
    %22 = arith.addf %19, %21 : vector<8x1xf32>
    %23 = tpu.iota {dimensions = array<i32: 0>} : vector<8x1xi32>
    %c8_i32 = arith.constant 8 : i32
    %24 = arith.muli %arg0, %c8_i32 : i32
    %25 = vector.broadcast %24 : i32 to vector<8x1xi32>
    %26 = arith.addi %23, %25 : vector<8x1xi32>
    %c8_i32_10 = arith.constant 8 : i32
    %27 = vector.broadcast %c8_i32_10 : i32 to vector<8x1xi32>
    %28 = arith.cmpi slt, %26, %27 : vector<8x1xi32>
    %cst_11 = arith.constant 0.000000e+00 : f32
    %29 = vector.broadcast %cst_11 : f32 to vector<8x1xf32>
    %30 = arith.select %28, %22, %29 : vector<8x1xi1>, vector<8x1xf32>
    %c0_12 = arith.constant 0 : index
    %c0_13 = arith.constant 0 : index
    %31 = vector.load %arg4[%c0_12, %c0_13] : memref<1x1xf32, #tpu.memory_space<vmem>>, vector<1x1xf32>
    %32 = vector.shape_cast %30 : vector<8x1xf32> to vector<1x8x1xf32>
    %cst_14 = arith.constant dense<0.000000e+00> : vector<1xf32>
    %33 = vector.multi_reduction <add>, %32, %cst_14 [1, 2] : vector<1x8x1xf32> to vector<1xf32>
    %34 = vector.shape_cast %33 : vector<1xf32> to vector<1x1x1xf32>
    %35 = vector.extract %34[0, 0, 0] : f32 from vector<1x1x1xf32>
    %36 = vector.broadcast %35 : f32 to vector<1x1xf32>
    %37 = arith.addf %31, %36 : vector<1x1xf32>
    %c0_15 = arith.constant 0 : index
    %c0_16 = arith.constant 0 : index
    %38 = vector.load %arg4[%c0_15, %c0_16] : memref<1x1xf32, #tpu.memory_space<vmem>>, vector<1x1xf32>
    tpu.vector_store %arg4[%c0_15, %c0_16], %37 {strides = array<i32>} : memref<1x1xf32, #tpu.memory_space<vmem>>, vector<1x1xf32>,
    %c0_i32_17 = arith.constant 0 : i32
    %39 = arith.cmpi eq, %arg0, %c0_i32_17 : i32
    %40 = arith.extui %39 : i1 to i32
    %c0_i32_18 = arith.constant 0 : i32
    %41 = arith.cmpi ne, %40, %c0_i32_18 : i32
    scf.if %41 {
      %c0_19 = arith.constant 0 : index
      %c0_20 = arith.constant 0 : index
      %42 = vector.load %arg4[%c0_19, %c0_20] : memref<1x1xf32, #tpu.memory_space<vmem>>, vector<1x1xf32>
      %cst_21 = arith.constant 1.250000e-01 : f32
      %43 = vector.broadcast %cst_21 : f32 to vector<1x1xf32>
      %44 = arith.mulf %42, %43 : vector<1x1xf32>
      %c0_22 = arith.constant 0 : index
      %c0_23 = arith.constant 0 : index
      %45 = vector.load %arg4[%c0_22, %c0_23] : memref<1x1xf32, #tpu.memory_space<vmem>>, vector<1x1xf32>
      tpu.vector_store %arg4[%c0_22, %c0_23], %44 {strides = array<i32>} : memref<1x1xf32, #tpu.memory_space<vmem>>, vector<1x1xf32>,
    } else {
    }
    return
  }
  func.func @transform_0(%arg0: i32) -> (i32, i32) {
    %c0_i32 = arith.constant 0 : i32
    %c0_i32_0 = arith.constant 0 : i32
    return %arg0, %c0_i32 : i32, i32
  }
  func.func @transform_1(%arg0: i32) -> (i32, i32) {
    %c0_i32 = arith.constant 0 : i32
    %c0_i32_0 = arith.constant 0 : i32
    return %arg0, %c0_i32 : i32, i32
  }
  func.func @transform_2(%arg0: i32) -> (i32, i32) {
    %c0_i32 = arith.constant 0 : i32
    %c0_i32_0 = arith.constant 0 : i32
    return %arg0, %c0_i32 : i32, i32
  }
  func.func @transform_3(%arg0: i32) -> (i32, i32) {
    %c0_i32 = arith.constant 0 : i32
    %c0_i32_0 = arith.constant 0 : i32
    %c0_i32_1 = arith.constant 0 : i32
    return %c0_i32, %c0_i32_0 : i32, i32
  }
}

</mosaic_0001>

<bundles_post_ra>
// kernel: tpu_custom_call.1
= control target key start
LH: loop header
LB: loop body
LE: loop exit
PB: predicated region body
PF: predicated region fallthrough
CT: control target
= control target key end

     0   :  { %8 = vsyncpa [#allocation3], 0  ;;  %s207_s0 = inlined_call_operand.vmem [shape: f32[8,32], index: 0, kind: input, shape index: {}]   ;;  %s208_s1 = inlined_call_operand.hbm [shape: f32[8,32], index: 1, kind: input, shape index: {}]   ;;  %s209_s2 = inlined_call_operand.vmem [shape: f32[8,1], index: 2, kind: input, shape index: {}]   ;;  %s210_s3 = inlined_call_operand.hbm [shape: f32[1,1], index: 3, kind: output, shape index: {}]  }
   0x1   :  { %9 = vsyncpa [#allocation4], 0  ;;  %s17_s14 = sshll.u32 %s208_s1, 4  ;;  %s169_s15 = smov [#allocation2]   ;;  %s18_s14 = int_to_ptr.hbm [resolvable:$true] %s17_s14 }
   0x2   :  { %s19_s16 = sshll.u32 %s169_s15, 4  ;;  %s20_s16 = int_to_ptr.vmem [resolvable:$true] %s19_s16 }
   0x3   :  { %22 = dma.hbm_to_vmem [thread:$0]  %s18_s14, 128, %s20_s16, [#allocation3]  }
   0x4   :  { %165 = dma.done.wait [#allocation3], 128  }
   0x5   :  { %166 = vsyncadd [#allocation3], 4294967168  ;;  %v35_v0 = vld [vmem:[%s207_s0] sm:$0xff]  ;;  %vm41_vm0 = vcmask 261120   ;;  %vm72_vm3 = vcmask 7168   ;;  %vm33_vm4 = vcmask 0  }
   0x6   :  { %v36_v1 = vld [vmem:[#allocation2] sm:$0xff]  ;;  %v170_v26 = vmov 0.0   ;;  %s171_s19 = smov [#allocation5]   ;;  %s100_s23 = sshll.u32 %s210_s3, 4  ;;  %s101_s23 = int_to_ptr.hbm [resolvable:$true] %s100_s23 }
   0x7   :  { %v38_v2 = vsub.f32 %v35_v0, %v36_v1  ;;  %v37_v16 = vld [vmem:[%s209_s2] sm:$0xff]  ;;  %34 = vst.msk [vmem:[#allocation5] sm:$0x1] %vm33_vm4, %v170_v26  ;;  %s98_s20 = sshll.u32 %s171_s19, 4  ;;  %s99_s20 = int_to_ptr.vmem [resolvable:$true] %s98_s20 }
   0x8   :  { %v59_v20 = vsub.f32 1.0, %v37_v16 }
   0x9   :  { %v39_v3 = vadd.f32 1e-06, %v38_v2 }
   0xb   :  { %v40_v4 = vmul.f32 %v39_v3, %v39_v3 }
   0xd   :  { %v42_v5 = vsel %vm41_vm0, %v40_v4, 0.0 }
   0xe   :  { %43 = vadd.xlane.f32.xlu0 %v42_v5  ;;  %v71_v34 = vld [vmem:[#allocation5] sm:$0x1] }
  0x81   :  { %v44_v6 = vpop.xlane.xlu0 %43 }
  0x82   :  { %115 = vrsqrt.f32 %v44_v6  ;;  %vm52_vm1 = vcmp.eq.f32.partialorder %v44_v6, inf  ;;  %v55_v14 = vand.u32 2147483648, %v44_v6  ;;  %vm54_vm2 = vcmp.eq.f32.partialorder %v44_v6, 0.0 }
  0x83   :  { %v60_v22 = vmul.f32 %v59_v20, %v44_v6 }
  0x88   :  { %v116_v7 = vpop.eup %115 }
  0x89   :  { %v46_v8 = vmul.f32 %v116_v7, %v44_v6 }
  0x8b   :  { %v47_v9 = vmul.f32 %v116_v7, %v46_v8 }
  0x8d   :  { %v48_v10 = vmul.f32 0.5, %v47_v9 }
  0x8f   :  { %v49_v11 = vsub.f32 1.5, %v48_v10 }
  0x91   :  { %v50_v12 = vmul.f32 %v116_v7, %v49_v11 }
  0x93   :  { %v51_v13 = vmul.f32 %v50_v12, %v44_v6 }
  0x95   :  { %v53_v15 = vsel %vm52_vm1, %v44_v6, %v51_v13 }
  0x96   :  { %v56_v17 = vsel %vm54_vm2, %v55_v14, %v53_v15 }
  0x97   :  { %v57_v18 = vsub.f32 1.0, %v56_v17 }
  0x99   :  { %v58_v19 = vmax.f32 %v57_v18, 0.0 }
  0x9b   :  { %v61_v21 = vmul.f32 %v58_v19, %v37_v16 }
  0x9d   :  { %v62_v23 = vmul.f32 %v61_v21, %v58_v19 }
  0x9f   :  { %v63_v24 = vadd.f32 %v62_v23, %v60_v22 }
  0xa1   :  { %v73_v25 = vsel %vm72_vm3, %v63_v24, 0.0 }
  0xa2   :  { %74 = vadd.xlane.f32.xlu0 %v73_v25 }
 0x115   :  { %v75_v27 = vpop.xlane.xlu0 %74 }
 0x116   :  { %v76_v28 = vrot.slane %v75_v27, 4 }
 0x118   :  { %v77_v29 = vadd.f32 %v76_v28, %v75_v27 }
 0x11a   :  { %v78_v30 = vrot.slane %v77_v29, 2 }
 0x11c   :  { %v79_v31 = vadd.f32 %v78_v30, %v77_v29 }
 0x11e   :  { %v80_v32 = vrot.slane %v79_v31, 1 }
 0x120   :  { %v81_v33 = vadd.f32 %v80_v32, %v79_v31 }
 0x122   :  { %110 = vpush %v81_v33 }
 0x153   :  { %s111_s2 = spop %110 }
 0x154   :  { %v83_v35 = vstv %s111_s2 }
 0x155   :  { %v84_v36 = vadd.f32 %v83_v35, %v71_v34 }
 0x157   :  { %86 = vst.msk [vmem:[#allocation5] sm:$0x1] %vm33_vm4, %v84_v36 }
 0x15e   :  { %v90_v37 = vld [vmem:[#allocation5] sm:$0x1] }
 0x15f   :  { %v91_v38 = vmul.f32 0.125, %v90_v37 }
 0x161   :  { %92 = vst.msk [vmem:[#allocation5] sm:$0x1] %vm33_vm4, %v91_v38 }
 0x162   :  { %103 = dma.vmem_to_hbm [thread:$0]  %s99_s20, 16, %s101_s23, [#allocation4]  }
 0x163   :  { %167 = dma.done.wait [#allocation4], 16  }
 0x164   :  { %168 = vsyncadd [#allocation4], 4294967280 }
 0x165   :  { %108 = vsyncpa [#allocation3], 1 }
 0x166   :  { %109 = vsyncpa [#allocation4], 1 }

</bundles_post_ra>
